<compile_context>
chip_gen: v5e
topology: v5e:2x2
jax: 0.10.0
libtpu: 0.0.40
codegen_flags: <defaults>
</compile_context>

<pallas_src>
import math

import jax
import jax.numpy as jnp
from jax import lax
from jax.experimental import pallas as pl
from jax.experimental.pallas import tpu as pltpu


def _softmax_probs(scores):
    """Numerically stable softmax over the last axis (f32 in, f32 out)."""
    m = jnp.max(scores, axis=-1, keepdims=True)
    e = jnp.exp(scores - m)
    denom = jnp.sum(e, axis=-1, keepdims=True)
    # EUP approximate reciprocal (free slot alongside VPU/MXU work) + one
    # Newton step to recover ~full f32 precision.
    inv = pl.reciprocal(denom, approx=True)
    inv = inv * (2.0 - denom * inv)
    return e * inv


def _attention_kernel(q_ref, k_ref, v_ref, o_ref, s_ref):
    # q_ref: (TQ, D); k_ref, v_ref: (S, D); o_ref: (TQ, D); s_ref: (TQ, S)
    q = q_ref[...]
    k = k_ref[...]
    v = v_ref[...]
    inv_sqrt_d = jnp.float32(1.0 / math.sqrt(q_ref.shape[-1]))

    # Q @ K^T without materializing a transpose: contract last axis of both.
    scores = lax.dot_general(
        q, k, dimension_numbers=(((1,), (1,)), ((), ())),
        preferred_element_type=jnp.float32) * inv_sqrt_d

    probs = _softmax_probs(scores)
    s_ref[...] = probs.astype(s_ref.dtype)
    # probs @ V on the MXU; feed operands in the value dtype (bf16 stays bf16).
    o_ref[...] = jnp.dot(probs.astype(v.dtype), v,
                         preferred_element_type=jnp.float32).astype(o_ref.dtype)


def _attention_kernel_masked(q_ref, k_ref, v_ref, m_ref, o_ref, s_ref):
    # Same as above, but the mask fill (AFTER softmax, value -100000 — exactly
    # like the PyTorch reference) and the second matmul happen in-kernel.
    q = q_ref[...]
    k = k_ref[...]
    v = v_ref[...]
    inv_sqrt_d = jnp.float32(1.0 / math.sqrt(q_ref.shape[-1]))

    scores = lax.dot_general(
        q, k, dimension_numbers=(((1,), (1,)), ((), ())),
        preferred_element_type=jnp.float32) * inv_sqrt_d

    probs = _softmax_probs(scores)
    probs = jnp.where(m_ref[...] == 0, jnp.float32(-100000.0), probs)
    s_ref[...] = probs.astype(s_ref.dtype)
    o_ref[...] = jnp.dot(probs.astype(v.dtype), v,
                         preferred_element_type=jnp.float32).astype(o_ref.dtype)


def _pick_tq(S, D, itemsize):
    """Largest query tile whose working set fits comfortably in scoped VMEM.

    Budget ~24 MiB: safely under the 32 MiB default scoped VMEM limit on every
    generation (v5e/v6e: 128 MiB physical, v7x: 64 MiB physical), leaving
    headroom for double-buffering and compiler scratch, so no vmem_limit
    override is needed.
    """
    budget = 24 * 1024 * 1024
    for tq in (512, 256, 128, 64, 32, 16, 8):
        if S % tq != 0:
            continue
        kv_bytes = 2 * 2 * S * D * itemsize        # K + V, double-buffered
        qo_bytes = 2 * 2 * tq * D * itemsize       # Q + out, double-buffered
        probs_bytes = 2 * tq * S * itemsize        # probs output, double-buffered
        f32_tmp = 2 * tq * S * 4                   # f32 scores / exp intermediates
        if kv_bytes + qo_bytes + probs_bytes + f32_tmp <= budget:
            return tq
    # S not a multiple of 8 (or K/V alone exceed budget): full-S block fallback.
    # TODO(synk): flash-style KV-axis tiling for very long sequences where K/V
    # themselves do not fit in VMEM.
    return S


def attention(queries, keys, values, mask=None):
    """Pallas TPU implementation of the reference Attention.forward.

    queries, keys, values: (B, H, S, D). mask: optional, broadcastable to
    (B, H, S, S); positions where mask == 0 are filled with -100000 AFTER the
    softmax (matching the PyTorch reference).

    Returns (output, attention_score): (B, H, S, D) and (B, H, S, S).
    """
    B, H, S, D = queries.shape
    dtype = queries.dtype

    # Fuse (B, H) into one grid axis: fewer, fatter grid steps and a larger,
    # even parallel extent for megacore / 2-TC sharding.
    q3 = queries.reshape(B * H, S, D)
    k3 = keys.reshape(B * H, S, D)
    v3 = values.reshape(B * H, S, D)

    tq = _pick_tq(S, D, jnp.dtype(dtype).itemsize)
    grid = (B * H, S // tq)

    q_spec = pl.BlockSpec((None, tq, D), lambda bh, qi: (bh, qi, 0))
    kv_spec = pl.BlockSpec((None, S, D), lambda bh, qi: (bh, 0, 0))
    out_spec = pl.BlockSpec((None, tq, D), lambda bh, qi: (bh, qi, 0))
    score_spec = pl.BlockSpec((None, tq, S), lambda bh, qi: (bh, qi, 0))

    out_shape = (
        jax.ShapeDtypeStruct((B * H, S, D), dtype),
        jax.ShapeDtypeStruct((B * H, S, S), dtype),
    )
    compiler_params = pltpu.CompilerParams(
        dimension_semantics=("parallel", "parallel"))

    if mask is None:
        out, probs = pl.pallas_call(
            _attention_kernel,
            out_shape=out_shape,
            grid_spec=pltpu.PrefetchScalarGridSpec(
                num_scalar_prefetch=0,
                grid=grid,
                in_specs=[q_spec, kv_spec, kv_spec],
                out_specs=(out_spec, score_spec),
            ),
            compiler_params=compiler_params,
        )(q3, k3, v3)
    else:
        mask3 = jnp.broadcast_to(mask, (B, H, S, S)).astype(jnp.int32)
        mask3 = mask3.reshape(B * H, S, S)
        mask_spec = pl.BlockSpec((None, tq, S), lambda bh, qi: (bh, qi, 0))
        out, probs = pl.pallas_call(
            _attention_kernel_masked,
            out_shape=out_shape,
            grid_spec=pltpu.PrefetchScalarGridSpec(
                num_scalar_prefetch=0,
                grid=grid,
                in_specs=[q_spec, kv_spec, kv_spec, mask_spec],
                out_specs=(out_spec, score_spec),
            ),
            compiler_params=compiler_params,
        )(q3, k3, v3, mask3)

    return out.reshape(B, H, S, D), probs.reshape(B, H, S, S)


def _reference_attention(queries, keys, values, mask=None):
    # Pure-JAX mirror of the PyTorch module, for verification.
    d = values.shape[3]
    scores = jnp.einsum("bhqd,bhkd->bhqk", queries, keys) / math.sqrt(d)
    probs = jax.nn.softmax(scores, axis=-1)
    if mask is not None:
        probs = jnp.where(mask == 0, -100000.0, probs)
    return jnp.einsum("bhqk,bhkd->bhqd", probs, values), probs


if __name__ == "__main__":
    key = jax.random.PRNGKey(0)
    kq, kk, kv, km = jax.random.split(key, 4)

    B, H, S, D = 2, 4, 8, 32
    queries = jax.random.normal(kq, (B, H, S, D), dtype=jnp.float32)
    keys = jax.random.normal(kk, (B, H, S, D), dtype=jnp.float32)
    values = jax.random.normal(kv, (B, H, S, D), dtype=jnp.float32)

    # --- Unmasked path ---
    out, probs = attention(queries, keys, values, mask=None)
    out = jax.block_until_ready(out)
    probs = jax.block_until_ready(probs)
    ref_out, ref_probs = _reference_attention(queries, keys, values, mask=None)
    assert out.shape == (B, H, S, D) and probs.shape == (B, H, S, S)
    assert jnp.allclose(out, ref_out, atol=1e-3, rtol=1e-3)
    assert jnp.allclose(probs, ref_probs, atol=1e-3, rtol=1e-3)

    # --- Masked path (mask applied AFTER softmax, exactly as the reference) ---
    mask = (jax.random.uniform(km, (B, 1, S, S)) > 0.3).astype(jnp.int32)
    m_out, m_probs = attention(queries, keys, values, mask=mask)
    m_out = jax.block_until_ready(m_out)
    m_probs = jax.block_until_ready(m_probs)
    ref_m_out, ref_m_probs = _reference_attention(queries, keys, values, mask=mask)
    assert jnp.allclose(m_probs, ref_m_probs, atol=1e-3, rtol=1e-3)
    # Masked output sums terms of magnitude ~1e5 (-100000 fill * V), so f32
    # accumulation-order differences leave O(0.1) absolute residuals.
    assert jnp.allclose(m_out, ref_m_out, atol=1.0, rtol=1e-3)

    print("KERNEL_OK")
</pallas_src>

<mosaic_0001>
module attributes {stable_mosaic.version = 11 : i64} {
  func.func @_attention_kernel(%arg0: i32, %arg1: i32, %arg2: memref<1x8x32xf32, #tpu.memory_space<vmem>>, %arg3: memref<1x8x32xf32, #tpu.memory_space<vmem>>, %arg4: memref<1x8x32xf32, #tpu.memory_space<vmem>>, %arg5: memref<1x8x32xf32, #tpu.memory_space<vmem>>, %arg6: memref<1x8x8xf32, #tpu.memory_space<vmem>>) attributes {dimension_semantics = [#tpu.dimension_semantics<parallel>, #tpu.dimension_semantics<parallel>], iteration_bounds = array<i64: 8, 1>, scalar_prefetch = 0 : i64, scratch_operands = 0 : i64, tpu.core_type = #tpu.core_type<tc>, window_params = [{transform_indices = @transform_0, window_bounds = array<i64: 1, 8, 32>}, {transform_indices = @transform_1, window_bounds = array<i64: 1, 8, 32>}, {transform_indices = @transform_2, window_bounds = array<i64: 1, 8, 32>}, {transform_indices = @transform_3, window_bounds = array<i64: 1, 8, 32>}, {transform_indices = @transform_4, window_bounds = array<i64: 1, 8, 8>}]} {
    %c0 = arith.constant 0 : index
    %c0_0 = arith.constant 0 : index
    %c0_1 = arith.constant 0 : index
    %0 = vector.load %arg2[%c0, %c0_0, %c0_1] : memref<1x8x32xf32, #tpu.memory_space<vmem>>, vector<1x8x32xf32>
    %1 = vector.shape_cast %0 : vector<1x8x32xf32> to vector<8x32xf32>
    %c0_2 = arith.constant 0 : index
    %c0_3 = arith.constant 0 : index
    %c0_4 = arith.constant 0 : index
    %2 = vector.load %arg3[%c0_2, %c0_3, %c0_4] : memref<1x8x32xf32, #tpu.memory_space<vmem>>, vector<1x8x32xf32>
    %3 = vector.shape_cast %2 : vector<1x8x32xf32> to vector<8x32xf32>
    %c0_5 = arith.constant 0 : index
    %c0_6 = arith.constant 0 : index
    %c0_7 = arith.constant 0 : index
    %4 = vector.load %arg4[%c0_5, %c0_6, %c0_7] : memref<1x8x32xf32, #tpu.memory_space<vmem>>, vector<1x8x32xf32>
    %5 = vector.shape_cast %4 : vector<1x8x32xf32> to vector<8x32xf32>
    %cst = arith.constant dense<0.000000e+00> : vector<8x8xf32>
    %6 = tpu.matmul %1, %3, %cst {dimension_numbers = #tpu.dot_dimension_numbers<[1], [1], [0], [0], [0, 0, 1, 0], [], []>} : vector<8x32xf32>, vector<8x32xf32>, vector<8x8xf32> -> vector<8x8xf32>
    %cst_8 = arith.constant 0.176776692 : f32
    %7 = vector.broadcast %cst_8 : f32 to vector<8x8xf32>
    %8 = arith.mulf %6, %7 : vector<8x8xf32>
    %cst_9 = arith.constant dense<0xFF800000> : vector<8xf32>
    %9 = vector.multi_reduction <maximumf>, %8, %cst_9 [1] : vector<8x8xf32> to vector<8xf32>
    %10 = vector.shape_cast %9 : vector<8xf32> to vector<8x1xf32>
    %11 = vector.broadcast %10 : vector<8x1xf32> to vector<8x8xf32>
    %12 = arith.subf %8, %11 : vector<8x8xf32>
    %13 = math.exp %12 : vector<8x8xf32>
    %cst_10 = arith.constant dense<0.000000e+00> : vector<8xf32>
    %14 = vector.multi_reduction <add>, %13, %cst_10 [1] : vector<8x8xf32> to vector<8xf32>
    %15 = vector.shape_cast %14 : vector<8xf32> to vector<8x1xf32>
    %16 = tpu.reciprocal %15 {approx = true} : vector<8x1xf32> -> vector<8x1xf32>
    %17 = arith.mulf %15, %16 : vector<8x1xf32>
    %cst_11 = arith.constant 2.000000e+00 : f32
    %18 = vector.broadcast %cst_11 : f32 to vector<8x1xf32>
    %19 = arith.subf %18, %17 : vector<8x1xf32>
    %20 = arith.mulf %16, %19 : vector<8x1xf32>
    %21 = vector.broadcast %20 : vector<8x1xf32> to vector<8x8xf32>
    %22 = arith.mulf %13, %21 : vector<8x8xf32>
    %c0_12 = arith.constant 0 : index
    %c0_13 = arith.constant 0 : index
    %c0_14 = arith.constant 0 : index
    %23 = vector.load %arg6[%c0_12, %c0_13, %c0_14] : memref<1x8x8xf32, #tpu.memory_space<vmem>>, vector<1x8x8xf32>
    %24 = vector.shape_cast %23 : vector<1x8x8xf32> to vector<8x8xf32>
    %25 = vector.shape_cast %22 : vector<8x8xf32> to vector<1x8x8xf32>
    tpu.vector_store %arg6[%c0_12, %c0_13, %c0_14], %25 {strides = array<i32>} : memref<1x8x8xf32, #tpu.memory_space<vmem>>, vector<1x8x8xf32>,
    %cst_15 = arith.constant dense<0.000000e+00> : vector<8x32xf32>
    %26 = tpu.matmul %22, %5, %cst_15 {dimension_numbers = #tpu.dot_dimension_numbers<[1], [0], [0], [1], [0, 0, 1, 1], [], []>} : vector<8x8xf32>, vector<8x32xf32>, vector<8x32xf32> -> vector<8x32xf32>
    %c0_16 = arith.constant 0 : index
    %c0_17 = arith.constant 0 : index
    %c0_18 = arith.constant 0 : index
    %27 = vector.load %arg5[%c0_16, %c0_17, %c0_18] : memref<1x8x32xf32, #tpu.memory_space<vmem>>, vector<1x8x32xf32>
    %28 = vector.shape_cast %27 : vector<1x8x32xf32> to vector<8x32xf32>
    %29 = vector.shape_cast %26 : vector<8x32xf32> to vector<1x8x32xf32>
    tpu.vector_store %arg5[%c0_16, %c0_17, %c0_18], %29 {strides = array<i32>} : memref<1x8x32xf32, #tpu.memory_space<vmem>>, vector<1x8x32xf32>,
    return
  }
  func.func @transform_0(%arg0: i32, %arg1: i32) -> (i32, i32, i32) {
    %c0_i32 = arith.constant 0 : i32
    %c0_i32_0 = arith.constant 0 : i32
    return %arg0, %arg1, %c0_i32 : i32, i32, i32
  }
  func.func @transform_1(%arg0: i32, %arg1: i32) -> (i32, i32, i32) {
    %c0_i32 = arith.constant 0 : i32
    %c0_i32_0 = arith.constant 0 : i32
    %c0_i32_1 = arith.constant 0 : i32
    return %arg0, %c0_i32, %c0_i32_0 : i32, i32, i32
  }
  func.func @transform_2(%arg0: i32, %arg1: i32) -> (i32, i32, i32) {
    %c0_i32 = arith.constant 0 : i32
    %c0_i32_0 = arith.constant 0 : i32
    %c0_i32_1 = arith.constant 0 : i32
    return %arg0, %c0_i32, %c0_i32_0 : i32, i32, i32
  }
  func.func @transform_3(%arg0: i32, %arg1: i32) -> (i32, i32, i32) {
    %c0_i32 = arith.constant 0 : i32
    %c0_i32_0 = arith.constant 0 : i32
    return %arg0, %arg1, %c0_i32 : i32, i32, i32
  }
  func.func @transform_4(%arg0: i32, %arg1: i32) -> (i32, i32, i32) {
    %c0_i32 = arith.constant 0 : i32
    %c0_i32_0 = arith.constant 0 : i32
    return %arg0, %arg1, %c0_i32 : i32, i32, i32
  }
}

</mosaic_0001>

<bundles_post_ra>
// kernel: tpu_custom_call.1
= control target key start
LH: loop header
LB: loop body
LE: loop exit
PB: predicated region body
PF: predicated region fallthrough
CT: control target
= control target key end

     0   :  { %s1104_s0 = inlined_call_operand.hbm [shape: f32[8,8,32], index: 0, kind: input, shape index: {}]   ;;  %s1105_s1 = inlined_call_operand.hbm [shape: f32[8,8,32], index: 1, kind: input, shape index: {}]   ;;  %s1106_s2 = inlined_call_operand.hbm [shape: f32[8,8,32], index: 2, kind: input, shape index: {}]   ;;  %s1107_s3 = inlined_call_operand.hbm [shape: f32[8,8,32], index: 3, kind: output, shape index: {0}]   ;;  %s1108_s4 = inlined_call_operand.hbm [shape: f32[8,8,8], index: 4, kind: output, shape index: {1}]  }
   0x1   :  { %1112 = sst [smem:[#allocation19_spill]] %s1105_s1 }
   0x2   :  { %10 = vsyncpa [#allocation3], 0 }
   0x3   :  { %12 = vsyncpa [#allocation3 + $0x1], 0 }
   0x4   :  { %13 = vsyncpa [#allocation6], 0 }
   0x5   :  { %15 = vsyncpa [#allocation6 + $0x1], 0 }
   0x6   :  { %16 = vsyncpa [#allocation4], 0 }
   0x7   :  { %18 = vsyncpa [#allocation4 + $0x1], 0 }
   0x8   :  { %19 = vsyncpa [#allocation10], 0 }
   0x9   :  { %21 = vsyncpa [#allocation10 + $0x1], 0  ;;  %s926_s15 = smov 0   ;;  %s928_s16 = smov 0  }
   0xa   :  { %s930_s17 = smov 0   ;;  %s932_s18 = smov 0  }
   0xb   :  { %s934_s19 = smov 0   ;;  %s936_s20 = smov 0  }
   0xc LB: > { %1113 = sst [smem:[#allocation15_spill]] %s887_s17  ;;  %s957_s21 = sadd.s32 4294967295, %s899_s20   ;;  %s899_s20 = sphi %s936_s20, %s27_s20   ;;  %s895_s19 = sphi %s934_s19, %s1127_s19   ;;  %s891_s18 = sphi %s932_s18, %s1126_s18   ;;  %s887_s17 = sphi %s930_s17, %s1125_s17   ;;  %s883_s16 = sphi %s928_s16, %s1129_s16   ;;  %s879_s15 = sphi %s926_s15, %s1128_s15  }
   0xd   : > { %1114 = sst [smem:[#allocation16_spill]] %s895_s19  ;;  %s586_s22 = sadd.s32 4294967294, %s899_s20  }
   0xe   : > { %s39_s23 = sadd.s32 1, %s895_s19  ;;  %s48_s24 = sadd.s32 1, %s887_s17 }
   0xf   : > { %p41_p0 = scmp.ge.s32.totalorder %s39_s23, 8  ;;  %p55_p1 = scmp.ne.s32.totalorder %s887_s17, %s883_s16 }
  0x10   : > { %p56_p2 = scmp.eq.s32.totalorder %s899_s20, 0  ;;  %p61_p3 = scmp.ne.s32.totalorder %s883_s16, %s879_s15 }
  0x11   : > { %s1131_s23 = smov (%p41_p0, %s39_s23), 0  ;;  %p62_p5 = scmp.eq.s32.totalorder %s957_s21, 0 }
  0x12   : > { %1115 = sst [smem:[#allocation17_spill]] %s1131_s23  ;;  %p969_p4 = por %p56_p2, %p55_p1 }
  0x13   : > { %s43_s26 = ssub.s32 %s895_s19, %s1131_s23  ;;  %p139_p6 = scmp.eq.s32.totalorder %s957_s21, 7 }
  0x14   : > { %p46_p7 = scmp.eq.s32.totalorder %s43_s26, 0  ;;  %p977_p8 = por %p62_p5, %p61_p3 }
  0x15   : > { %p981_p9 = por %p139_p6, %p55_p1  ;;  %p145_p10 = scmp.eq.s32.totalorder %s586_s22, 7 }
  0x16   : > { %s986_s29 = scalar_select %p46_p7, %s887_s17, %s48_s24  }
  0x17   : > { %p988_p11 = por %p145_p10, %p61_p3  ;;  %p637_p12 = scmp.lt.s32.totalorder %s899_s20, 8 }
  0x18   : > { %1119 = sst [smem:[#allocation18_spill]] %s986_s29  ;;  %s193_s5 = sand.u32 1, %s887_s17  }
  0x19   : > { %s589_s6 = sshll.u32 %s193_s5, 3  ;;  %s590_s7 = sshll.u32 %s895_s19, 3 }
  0x1a   : > { %p997_p13 = pnand %p637_p12, %p969_p4  ;;  %s213_s9 = sand.u32 1, %s899_s20  }
  0x1b   : > { %s1122_s1 = sld [smem:[#allocation19_spill]]  ;;  %s217_s14 = scalar_lea.vmem [#allocation5], %s589_s6 }
  0x1c   : > { %s225_s22 = sshll.u32 %s217_s14, 4  ;;  %s214_s24 = scalar_lea.sflag [#allocation6], %s213_s9  ;;  %s226_s22 = int_to_ptr.vmem [resolvable:$true] %s225_s22 }
  0x1d   : > { %p595_p0 = scmp.ge.s32.totalorder %s899_s20, 1  ;;  %p249_p1 = scmp.lt.s32.totalorder %s899_s20, 9 }
  0x1e   : > { %s202_s10 = scalar_lea.hbm %s1104_s0, %s590_s7  ;;  %s194_s14 = scalar_lea.sflag [#allocation3], %s193_s5 }
  0x1f   : > { %p1009_p2 = pnand %p595_p0, %p249_p1  ;;  %s204_s11 = sshll.u32 %s202_s10, 4  ;;  %s205_s11 = int_to_ptr.hbm [resolvable:$true] %s204_s11 }
  0x20   : > { %s236_s29 = scalar_lea.vmem [#allocation7], %s589_s6  ;;  %s1026_s23 = sand.u32 (!%p1009_p2), 1, %s883_s16  }
  0x21   : > { %s221_s12 = scalar_lea.hbm %s1122_s1, %s590_s7  ;;  %s244_s17 = sshll.u32 %s236_s29, 4  ;;  %s245_s17 = int_to_ptr.vmem [resolvable:$true] %s244_s17 }
  0x22   : > { %s223_s13 = sshll.u32 %s221_s12, 4  ;;  %s197_s12 = scalar_lea.vmem [#allocation2], %s589_s6  ;;  %s224_s13 = int_to_ptr.hbm [resolvable:$true] %s223_s13 }
  0x23   : > { %626 = dma.hbm_to_vmem [thread:$0]  (!%p997_p13), %s224_s13, 128, %s226_s22, %s214_s24  }
  0x24   : > { %s206_s1 = sshll.u32 %s197_s12, 4  ;;  %s240_s22 = scalar_lea.hbm %s1106_s2, %s590_s7  ;;  %s207_s1 = int_to_ptr.vmem [resolvable:$true] %s206_s1 }
  0x25   : > { %623 = dma.hbm_to_vmem [thread:$0]  (!%p997_p13), %s205_s11, 128, %s207_s1, %s194_s14  }
  0x26   : > { %s242_s19 = sshll.u32 %s240_s22, 4  ;;  %253 = sbr.rel (%p1009_p2) target bundleno = 568 (0x238), region = 32  ;;  %s243_s19 = int_to_ptr.hbm [resolvable:$true] %s242_s19 }
  0x27   : > { %629 = dma.hbm_to_vmem [thread:$0]  (!%p997_p13), %s243_s19, 128, %s245_s17, %s214_s24  }
  0x28   : > { %s1029_s1 = sshll.u32 (!%p1009_p2), %s1026_s23, 3  ;;  %s256_s5 = scalar_lea.sflag (!%p1009_p2), [#allocation3], %s1026_s23 }
  0x29   : > { %s259_s7 = scalar_lea.vmem (!%p1009_p2), [#allocation2], %s1029_s1 }
  0x2b   : > { %862 = dma.done.wait (%p977_p8), %s256_s5, 128  }
  0x2c   : > { %864 = vsyncadd (%p977_p8), %s256_s5, 4294967168  ;;  %s265_s17 = sand.u32 1, %s957_s21   ;;  %s269_s29 = scalar_lea.vmem [#allocation5], %s1029_s1 }
  0x2d   : > { %s266_s19 = scalar_lea.sflag [#allocation6], %s265_s17 }
  0x2e   : > { %866 = dma.done.wait (%p977_p8), %s266_s19, 256  }
  0x2f   : > { %868 = vsyncadd (%p977_p8), %s266_s19, 4294967040  ;;  %vm323_vm0 = vcmask 261120   ;;  %v321_v0 = vld [vmem:[%s269_s29] sm:$0xff]  ;;  %v320_v1 = vld [vmem:[%s259_s7] sm:$0xff]  ;;  %vm351_vm1 = vcmask 64512   ;;  %s279_s21 = scalar_lea.vmem [#allocation7], %s1029_s1 }
  0x30   : > { %601 = vmatpush.xpose.msk.msra.mxu0 %vm323_vm0, %v321_v0  ;;  %v322_v10 = vld [vmem:[%s279_s21] sm:$0xff]  ;;  %s606_s27 = sshll.u32 %s891_s18, 3  ;;  %s319_s25 = scalar_lea.vmem [#allocation9], %s1029_s1 }
  0x31   : > { %385 = vmatpush.msra.mxu1 %v322_v10  ;;  %s423_s24 = scalar_lea.hbm %s1108_s4, %s606_s27  ;;  %s425_s26 = sshll.u32 %s319_s25, 4  ;;  %s426_s26 = int_to_ptr.vmem [resolvable:$true] %s425_s26 }
  0x32   : > { %s427_s10 = sshll.u32 %s423_s24, 4  ;;  %s397_s11 = scalar_lea.sflag [#allocation10], %s1026_s23  ;;  %s428_s10 = int_to_ptr.hbm [resolvable:$true] %s427_s10 }
  0x33   : > { %602 = vmatmul.msk.f32.vlgmr.msra.gmra.mxu0 %vm323_vm0, %v320_v1  ;;  %s795_s12 = sshra.s32 %s428_s10, 4  ;;  %s801_s13 = scalar_lea.hbm %s1108_s4, 64  ;;  %s796_s12 = int_to_ptr.hbm [resolvable:$true] %s795_s12 }
  0x34   : > { %s797_s18 = scalar_lea.hbm %s796_s12, 8  ;;  %p802_p6 = scmp.lt.s32.totalorder %s796_s12, %s1108_s4 }
  0x35   : > { %p798_p3 = scmp.ne.s32.totalorder %s796_s12, %s797_s18  ;;  %p803_p7 = scmp.lt.s32.totalorder %s801_s13, %s797_s18 }
  0x37   : > { %p799_p4 = pnand %p798_p3, %p981_p9  ;;  %p804_p8 = por %p803_p7, %p802_p6 }
  0x39   : > { %p800_p5 = pneg %p799_p4 }
  0x3b   : > { %p805_p10 = pnand %p804_p8, %p800_p5 }
  0xb0   : > { %v347_v2 = vpop.f32.mrf.mxu0 }
  0xb1   : > { %v350_v3 = vmul.f32 0.17677669, %v347_v2 }
  0xb3   : > { %v352_v4 = vsel %vm351_vm1, %v350_v3, -inf }
  0xb4   : > { %353 = vmax.xlane.f32.xlu0 %v352_v4 }
 0x127   : > { %v354_v5 = vpop.xlane.xlu0 %353 }
 0x128   : > { %v355_v6 = vsub.f32 %v350_v3, %v354_v5 }
 0x12a   : > { %v356_v7 = vmul.f32 1.442695, %v355_v6 }
 0x12c   : > { %687 = vpow2.f32 %v356_v7 }
 0x132   : > { %v688_v8 = vpop.eup %687 }
 0x133   : > { %v358_v9 = vsel %vm351_vm1, %v688_v8, 0.0 }
 0x134   : > { %359 = vadd.xlane.f32.xlu0 %v358_v9 }
 0x1a7   : > { %v360_v11 = vpop.xlane.xlu0 %359 }
 0x1a8   : > { %689 = vrcp.f32 %v360_v11 }
 0x1ae   : > { %v690_v12 = vpop.eup %689 }
 0x1af   : > { %v362_v13 = vmul.f32 %v690_v12, %v360_v11 }
 0x1b1   : > { %v363_v14 = vsub.f32 2.0, %v362_v13 }
 0x1b3   : > { %v364_v15 = vmul.f32 %v690_v12, %v363_v14 }
 0x1b5   : > { %v365_v16 = vmul.f32 %v688_v8, %v364_v15 }
 0x1b7   : > { %603 = vmatmul.msk.f32.vlgmr.msra.gmra.mxu1 %vm351_vm1, %v365_v16  ;;  %366 = vst.msk [vmem:[%s319_s25] sm:$0xff] %vm351_vm1, %v365_v16 }
 0x1b8   : > { %808 = shalt.err (!%p805_p10)
}
 0x1b9   : > { %617 = dma.vmem_to_hbm [thread:$0]  (%p981_p9), %s426_s26, 128, %s428_s10, %s397_s11  }
 0x1ba   : > { %s408_s19 = scalar_lea.hbm %s1107_s3, %s606_s27  ;;  %s312_s29 = scalar_lea.vmem [#allocation8], %s1029_s1 }
 0x1bb   : > { %s410_s21 = sshll.u32 %s312_s29, 4  ;;  %s412_s6 = sshll.u32 %s408_s19, 4  ;;  %s411_s21 = int_to_ptr.vmem [resolvable:$true] %s410_s21  ;;  %s413_s6 = int_to_ptr.hbm [resolvable:$true] %s412_s6 }
 0x1bc   : > { %s392_s8 = scalar_lea.sflag [#allocation4], %s1026_s23  ;;  %s823_s24 = sshra.s32 %s413_s6, 4  ;;  %s824_s24 = int_to_ptr.hbm [resolvable:$true] %s823_s24 }
 0x1bd   : > { %s825_s25 = scalar_lea.hbm %s824_s24, 8  ;;  %s829_s27 = scalar_lea.hbm %s1107_s3, 64 }
 0x1be   : > { %p826_p12 = scmp.ne.s32.totalorder %s824_s24, %s825_s25  ;;  %p830_p1 = scmp.lt.s32.totalorder %s824_s24, %s1107_s3 }
 0x1bf   : > { %p831_p2 = scmp.lt.s32.totalorder %s829_s27, %s825_s25 }
 0x1c0   : > { %p827_p13 = pnand %p826_p12, %p981_p9 }
 0x1c1   : > { %p832_p3 = por %p831_p2, %p830_p1 }
 0x1c2   : > { %p828_p0 = pneg %p827_p13 }
 0x1c4   : > { %p833_p4 = pnand %p832_p3, %p828_p0 }
 0x234   : > { %v387_v17 = vpop.f32.mrf.mxu1 }
 0x235   : > { %390 = vst.msk [vmem:[%s312_s29] sm:$0xff] %vm323_vm0, %v387_v17 }
 0x236   : > { %836 = shalt.err (!%p833_p4)
}
 0x237   : > { %616 = dma.vmem_to_hbm [thread:$0]  (%p981_p9), %s411_s21, 128, %s413_s6, %s392_s8  }
 0x238 PF: > { %p638_p5 = scmp.ge.s32.totalorder %s899_s20, 2  ;;  %s439_s23 = sand.u32 1, %s879_s15  }
 0x239   : > { %s440_s12 = scalar_lea.sflag [#allocation4], %s439_s23 }
 0x23a   : > { %p631_p6 = pnand %p638_p5, %p988_p11 }
 0x23c   : > { %p632_p7 = pneg %p631_p6 }
 0x23e   : > { %870 = dma.done.wait (%p632_p7), %s440_s12, 128  }
 0x23f   : > { %872 = vsyncadd (%p632_p7), %s440_s12, 4294967168  ;;  %s450_s18 = scalar_lea.sflag [#allocation10], %s439_s23 }
 0x240   : > { %874 = dma.done.wait (%p632_p7), %s450_s18, 128  }
 0x241   : > { %876 = vsyncadd (%p632_p7), %s450_s18, 4294967168  ;;  %s27_s20 = sadd.s32 1, %s899_s20   ;;  %s1124_s28 = sld [smem:[#allocation15_spill]] }
 0x242   : > { %p24_p8 = scmp.ge.s32.totalorder %s27_s20, 10   ;;  %s1125_s17 = sld [smem:[#allocation18_spill]] }
 0x243   : > { %s1126_s18 = sld [smem:[#allocation16_spill]]  ;;  %s1128_s15 = smov %s883_s16 }
 0x244   : > { %s1127_s19 = sld [smem:[#allocation17_spill]]  ;;  %26 = sbr.rel (!%p24_p8) target bundleno = 12 (0xc), region = 118 }
 0x247   : > { %s1129_s16 = smov %s1124_s28 }
 0x249   :  { %456 = vsyncpa [#allocation3], 1 }
 0x24a   :  { %458 = vsyncpa [#allocation3 + $0x1], 1 }
 0x24b   :  { %459 = vsyncpa [#allocation6], 1 }
 0x24c   :  { %461 = vsyncpa [#allocation6 + $0x1], 1 }
 0x24d   :  { %462 = vsyncpa [#allocation4], 1 }
 0x24e   :  { %464 = vsyncpa [#allocation4 + $0x1], 1 }
 0x24f   :  { %465 = vsyncpa [#allocation10], 1 }
 0x250   :  { %467 = vsyncpa [#allocation10 + $0x1], 1 }

</bundles_post_ra>
